<compile_context>
chip_gen: v6e
topology: v6e:2x2x1
jax: 0.10.0
libtpu: 0.0.40
codegen_flags: <defaults>
</compile_context>

<pallas_src>
import functools

import jax
import jax.numpy as jnp
from jax.experimental import pallas as pl
from jax.experimental.pallas import tpu as pltpu


def _mymodel_kernel(params_ref, x_ref, o_ref, *, N, C, H, W):
    # params_ref: (C*C + C,) f32 SMEM -- [W[0,0..C-1], ..., W[C-1,..], b[0..C-1]]
    # x_ref:      (RP, WP)   f32 VMEM -- input flattened to (N*C*H, W), zero padded
    # o_ref:      (RP, WP)   f32 VMEM -- unpooled output, same padded layout
    RP, WP = x_ref.shape
    R = N * C * H                 # real rows
    PW = W // 2                   # pooled width (odd trailing column dropped)
    f32 = jnp.float32
    zero = f32(0.0)

    x = x_ref[...]

    # ---- hoisted index / parity / validity planes --------------------------
    r_i = jax.lax.broadcasted_iota(jnp.int32, (RP, WP), 0)
    w_i = jax.lax.broadcasted_iota(jnp.int32, (RP, WP), 1)
    h_odd = (r_i & 1) == 1        # h parity == row parity because H is even
    w_odd = (w_i & 1) == 1
    valid = (w_i < 2 * PW) & (r_i < R)

    # channel-of-row masks (static unrolled compares; no vector int div/mod)
    is_ch = []
    for c in range(C):
        m = None
        for n in range(N):
            lo = (n * C + c) * H
            rng = (r_i >= lo) & (r_i < lo + H)
            m = rng if m is None else (m | rng)
        is_ch.append(m)

    # ---- MaxPool2d(2, 2): per-channel-plane window max + winner flags ------
    # Window of anchor (even h, even w) is {(h,w),(h,w+1),(h+1,w),(h+1,w+1)}.
    v0 = x
    v1 = pltpu.roll(x, WP - 1, axis=1)     # x[r, w+1]
    v2 = pltpu.roll(x, RP - 1, axis=0)     # x[r+1, w]
    v3 = pltpu.roll(v1, RP - 1, axis=0)    # x[r+1, w+1]

    # Pairwise >= keeps the earlier offset on ties (first occurrence).
    cA = v0 >= v1
    vA = jnp.where(cA, v0, v1)
    cB = v2 >= v3
    vB = jnp.where(cB, v2, v3)
    cM = vA >= vB
    vmax = jnp.where(cM, vA, vB)           # valid at even (h, w) anchors

    # ---- Conv2d(C, C, 1) at the anchors: channel mixing via sublane rolls --
    # Row r holds channel co; input channel co+k for the same (n, h) lives k*H
    # rows away.  Rows whose co+k is out of range (or that wrapped across a
    # sample / into padding) get weight 0, so garbage never contributes.
    zeros_plane = jnp.zeros((RP, WP), f32)
    conv = None
    for k in range(-(C - 1), C):
        wplane = zeros_plane
        for co in range(C):
            ci = co + k
            if 0 <= ci < C:
                wplane = jnp.where(is_ch[co], params_ref[co * C + ci], wplane)
        if k == 0:
            shifted = vmax
        elif k > 0:
            shifted = pltpu.roll(vmax, RP - k * H, axis=0)   # vmax[r + k*H]
        else:
            shifted = pltpu.roll(vmax, -k * H, axis=0)       # vmax[r - |k|*H]
        term = shifted * wplane
        conv = term if conv is None else conv + term
    bplane = zeros_plane
    for co in range(C):
        bplane = jnp.where(is_ch[co], params_ref[C * C + co], bplane)
    conv = conv + bplane

    # ---- MaxUnpool2d: mask conv with the winner flag per window offset at the
    # anchor, then broadcast each plane to its offset with forward rolls. -----
    p0 = jnp.where(cM & cA, conv, zero)           # winner offset (0, 0)
    p1 = jnp.where(cM & (~cA), conv, zero)        # winner offset (0, 1)
    p2 = jnp.where((~cM) & cB, conv, zero)        # winner offset (1, 0)
    p3 = jnp.where((~cM) & (~cB), conv, zero)     # winner offset (1, 1)

    p1s = pltpu.roll(p1, 1, axis=1)                          # from (r, w-1)
    p2s = pltpu.roll(p2, 1, axis=0)                          # from (r-1, w)
    p3s = pltpu.roll(pltpu.roll(p3, 1, axis=1), 1, axis=0)   # from (r-1, w-1)

    out = jnp.where(h_odd,
                    jnp.where(w_odd, p3s, p2s),
                    jnp.where(w_odd, p1s, p0))
    # Single full-block, lane-dense (128-wide) store; the padding and the dropped
    # odd trailing column are zeroed by `valid`.
    o_ref[...] = jnp.where(valid, out, zero).astype(o_ref.dtype)


def mymodel_forward(x, conv_w, conv_b):
    """x: (N, C, H, W); conv_w: (C, C) (1x1 conv, spatial squeezed); conv_b: (C,)."""
    N, C, H, W = x.shape
    assert H % 2 == 0, "kernel assumes even H (unpool target equals input extent)"
    R = N * C * H
    RP = ((R + 7) // 8) * 8          # pad rows to a sublane multiple
    WP = ((W + 127) // 128) * 128    # pad cols to a lane multiple (lane-dense IO)

    x2 = jnp.pad(x.reshape(R, W).astype(jnp.float32),
                 ((0, RP - R), (0, WP - W)))
    params = jnp.concatenate(
        [conv_w.reshape(-1), conv_b.reshape(-1)]).astype(jnp.float32)

    out = pl.pallas_call(
        functools.partial(_mymodel_kernel, N=N, C=C, H=H, W=W),
        out_shape=jax.ShapeDtypeStruct((RP, WP), jnp.float32),
        in_specs=[
            pl.BlockSpec(memory_space=pltpu.MemorySpace.SMEM),   # packed w+b (12,)
            pl.BlockSpec(memory_space=pltpu.MemorySpace.VMEM),   # flattened x slab
        ],
        out_specs=pl.BlockSpec(memory_space=pltpu.MemorySpace.VMEM),
    )(params, x2)
    return out[:R, :W].reshape(N, C, H, W).astype(x.dtype)


def ref_forward(x, conv_w, conv_b):
    """Pure-JAX reference: maxpool(2,2)+indices -> 1x1 conv -> max-unpool."""
    N, C, H, W = x.shape
    PH, PW = H // 2, W // 2
    xw = x[:, :, :2 * PH, :2 * PW].reshape(N, C, PH, 2, PW, 2)
    win = xw.transpose(0, 1, 2, 4, 3, 5).reshape(N, C, PH, PW, 4)
    mx = win.max(-1)
    arg = jnp.argmax(win, axis=-1)                       # first occurrence
    dh, dw = arg // 2, arg % 2
    hh = jnp.arange(PH)[None, None, :, None] * 2 + dh
    ww = jnp.arange(PW)[None, None, None, :] * 2 + dw
    flat = hh * W + ww                                   # (N, C, PH, PW)
    conv = jnp.einsum('oc,ncpq->nopq', conv_w, mx,
                      precision=jax.lax.Precision.HIGHEST)
    conv = conv + conv_b[None, :, None, None]
    out = jnp.zeros((N, C, H * W), x.dtype)
    out = out.at[jnp.arange(N)[:, None, None, None],
                 jnp.arange(C)[None, :, None, None],
                 flat].set(conv)
    return out.reshape(N, C, H, W)


if __name__ == "__main__":
    key = jax.random.PRNGKey(0)
    kx, kw, kb = jax.random.split(key, 3)

    # Input implied by the forward: unpool target (6, 9) with kernel=stride=2
    # => input spatial (6, 9); Conv2d(3, 3, 1) => 3 channels.
    x = jax.random.normal(kx, (2, 3, 6, 9), dtype=jnp.float32)
    conv_w = jax.random.normal(kw, (3, 3), dtype=jnp.float32) * 0.5
    conv_b = jax.random.normal(kb, (3,), dtype=jnp.float32) * 0.1

    out = jax.block_until_ready(mymodel_forward(x, conv_w, conv_b))
    ref = jax.block_until_ready(ref_forward(x, conv_w, conv_b))

    assert out.shape == (2, 3, 6, 9)
    if not bool(jnp.allclose(out, ref, atol=1e-5, rtol=1e-5)):
        raise AssertionError("Pallas kernel output does not match reference")
    print("KERNEL_OK")
</pallas_src>

<mosaic_0001>
module attributes {stable_mosaic.version = 11 : i64} {
  func.func @_mymodel_kernel(%arg0: memref<12xf32, #tpu.memory_space<smem>>, %arg1: memref<40x128xf32, #tpu.memory_space<vmem>>, %arg2: memref<40x128xf32, #tpu.memory_space<vmem>>) attributes {dimension_semantics = [], scalar_prefetch = 0 : i64, scratch_operands = 0 : i64, tpu.core_type = #tpu.core_type<tc>} {
    %c0 = arith.constant 0 : index
    %c0_0 = arith.constant 0 : index
    %0 = vector.load %arg1[%c0, %c0_0] : memref<40x128xf32, #tpu.memory_space<vmem>>, vector<40x128xf32>
    %1 = tpu.iota {dimensions = array<i32: 0>} : vector<40x128xi32>
    %2 = tpu.iota {dimensions = array<i32: 1>} : vector<40x128xi32>
    %c1_i32 = arith.constant 1 : i32
    %3 = vector.broadcast %c1_i32 : i32 to vector<40x128xi32>
    %4 = arith.andi %1, %3 : vector<40x128xi32>
    %c1_i32_1 = arith.constant 1 : i32
    %5 = vector.broadcast %c1_i32_1 : i32 to vector<40x128xi32>
    %6 = arith.cmpi eq, %4, %5 : vector<40x128xi32>
    %c1_i32_2 = arith.constant 1 : i32
    %7 = vector.broadcast %c1_i32_2 : i32 to vector<40x128xi32>
    %8 = arith.andi %2, %7 : vector<40x128xi32>
    %c1_i32_3 = arith.constant 1 : i32
    %9 = vector.broadcast %c1_i32_3 : i32 to vector<40x128xi32>
    %10 = arith.cmpi eq, %8, %9 : vector<40x128xi32>
    %c8_i32 = arith.constant 8 : i32
    %11 = vector.broadcast %c8_i32 : i32 to vector<40x128xi32>
    %12 = arith.cmpi slt, %2, %11 : vector<40x128xi32>
    %c36_i32 = arith.constant 36 : i32
    %13 = vector.broadcast %c36_i32 : i32 to vector<40x128xi32>
    %14 = arith.cmpi slt, %1, %13 : vector<40x128xi32>
    %15 = arith.andi %12, %14 : vector<40x128xi1>
    %c0_i32 = arith.constant 0 : i32
    %16 = vector.broadcast %c0_i32 : i32 to vector<40x128xi32>
    %17 = arith.cmpi sge, %1, %16 : vector<40x128xi32>
    %c6_i32 = arith.constant 6 : i32
    %18 = vector.broadcast %c6_i32 : i32 to vector<40x128xi32>
    %19 = arith.cmpi slt, %1, %18 : vector<40x128xi32>
    %20 = arith.andi %17, %19 : vector<40x128xi1>
    %c18_i32 = arith.constant 18 : i32
    %21 = vector.broadcast %c18_i32 : i32 to vector<40x128xi32>
    %22 = arith.cmpi sge, %1, %21 : vector<40x128xi32>
    %c24_i32 = arith.constant 24 : i32
    %23 = vector.broadcast %c24_i32 : i32 to vector<40x128xi32>
    %24 = arith.cmpi slt, %1, %23 : vector<40x128xi32>
    %25 = arith.andi %22, %24 : vector<40x128xi1>
    %26 = arith.ori %20, %25 : vector<40x128xi1>
    %c6_i32_4 = arith.constant 6 : i32
    %27 = vector.broadcast %c6_i32_4 : i32 to vector<40x128xi32>
    %28 = arith.cmpi sge, %1, %27 : vector<40x128xi32>
    %c12_i32 = arith.constant 12 : i32
    %29 = vector.broadcast %c12_i32 : i32 to vector<40x128xi32>
    %30 = arith.cmpi slt, %1, %29 : vector<40x128xi32>
    %31 = arith.andi %28, %30 : vector<40x128xi1>
    %c24_i32_5 = arith.constant 24 : i32
    %32 = vector.broadcast %c24_i32_5 : i32 to vector<40x128xi32>
    %33 = arith.cmpi sge, %1, %32 : vector<40x128xi32>
    %c30_i32 = arith.constant 30 : i32
    %34 = vector.broadcast %c30_i32 : i32 to vector<40x128xi32>
    %35 = arith.cmpi slt, %1, %34 : vector<40x128xi32>
    %36 = arith.andi %33, %35 : vector<40x128xi1>
    %37 = arith.ori %31, %36 : vector<40x128xi1>
    %c12_i32_6 = arith.constant 12 : i32
    %38 = vector.broadcast %c12_i32_6 : i32 to vector<40x128xi32>
    %39 = arith.cmpi sge, %1, %38 : vector<40x128xi32>
    %c18_i32_7 = arith.constant 18 : i32
    %40 = vector.broadcast %c18_i32_7 : i32 to vector<40x128xi32>
    %41 = arith.cmpi slt, %1, %40 : vector<40x128xi32>
    %42 = arith.andi %39, %41 : vector<40x128xi1>
    %c30_i32_8 = arith.constant 30 : i32
    %43 = vector.broadcast %c30_i32_8 : i32 to vector<40x128xi32>
    %44 = arith.cmpi sge, %1, %43 : vector<40x128xi32>
    %c36_i32_9 = arith.constant 36 : i32
    %45 = vector.broadcast %c36_i32_9 : i32 to vector<40x128xi32>
    %46 = arith.cmpi slt, %1, %45 : vector<40x128xi32>
    %47 = arith.andi %44, %46 : vector<40x128xi1>
    %48 = arith.ori %42, %47 : vector<40x128xi1>
    %c127_i32 = arith.constant 127 : i32
    %49 = tpu.dynamic_rotate %0 by %c127_i32 dim 1 : vector<40x128xf32>, i32 -> vector<40x128xf32>
    %c39_i32 = arith.constant 39 : i32
    %50 = tpu.dynamic_rotate %0 by %c39_i32 dim 0 : vector<40x128xf32>, i32 -> vector<40x128xf32>
    %c39_i32_10 = arith.constant 39 : i32
    %51 = tpu.dynamic_rotate %49 by %c39_i32_10 dim 0 : vector<40x128xf32>, i32 -> vector<40x128xf32>
    %52 = arith.cmpf oge, %0, %49 : vector<40x128xf32>
    %53 = arith.select %52, %0, %49 : vector<40x128xi1>, vector<40x128xf32>
    %54 = arith.cmpf oge, %50, %51 : vector<40x128xf32>
    %55 = arith.select %54, %50, %51 : vector<40x128xi1>, vector<40x128xf32>
    %56 = arith.cmpf oge, %53, %55 : vector<40x128xf32>
    %57 = arith.select %56, %53, %55 : vector<40x128xi1>, vector<40x128xf32>
    %cst = arith.constant 0.000000e+00 : f32
    %58 = vector.broadcast %cst : f32 to vector<40x128xf32>
    %c6 = arith.constant 6 : index
    %59 = memref.load %arg0[%c6] : memref<12xf32, #tpu.memory_space<smem>>
    %60 = vector.broadcast %59 : f32 to vector<40x128xf32>
    %61 = arith.select %48, %60, %58 : vector<40x128xi1>, vector<40x128xf32>
    %c12_i32_11 = arith.constant 12 : i32
    %62 = tpu.dynamic_rotate %57 by %c12_i32_11 dim 0 : vector<40x128xf32>, i32 -> vector<40x128xf32>
    %63 = arith.mulf %62, %61 : vector<40x128xf32>
    %c3 = arith.constant 3 : index
    %64 = memref.load %arg0[%c3] : memref<12xf32, #tpu.memory_space<smem>>
    %65 = vector.broadcast %64 : f32 to vector<40x128xf32>
    %66 = arith.select %37, %65, %58 : vector<40x128xi1>, vector<40x128xf32>
    %c7 = arith.constant 7 : index
    %67 = memref.load %arg0[%c7] : memref<12xf32, #tpu.memory_space<smem>>
    %68 = vector.broadcast %67 : f32 to vector<40x128xf32>
    %69 = arith.select %48, %68, %66 : vector<40x128xi1>, vector<40x128xf32>
    %c6_i32_12 = arith.constant 6 : i32
    %70 = tpu.dynamic_rotate %57 by %c6_i32_12 dim 0 : vector<40x128xf32>, i32 -> vector<40x128xf32>
    %71 = arith.mulf %70, %69 : vector<40x128xf32>
    %72 = arith.addf %63, %71 : vector<40x128xf32>
    %c0_13 = arith.constant 0 : index
    %73 = memref.load %arg0[%c0_13] : memref<12xf32, #tpu.memory_space<smem>>
    %74 = vector.broadcast %73 : f32 to vector<40x128xf32>
    %75 = arith.select %26, %74, %58 : vector<40x128xi1>, vector<40x128xf32>
    %c4 = arith.constant 4 : index
    %76 = memref.load %arg0[%c4] : memref<12xf32, #tpu.memory_space<smem>>
    %77 = vector.broadcast %76 : f32 to vector<40x128xf32>
    %78 = arith.select %37, %77, %75 : vector<40x128xi1>, vector<40x128xf32>
    %c8 = arith.constant 8 : index
    %79 = memref.load %arg0[%c8] : memref<12xf32, #tpu.memory_space<smem>>
    %80 = vector.broadcast %79 : f32 to vector<40x128xf32>
    %81 = arith.select %48, %80, %78 : vector<40x128xi1>, vector<40x128xf32>
    %82 = arith.mulf %57, %81 : vector<40x128xf32>
    %83 = arith.addf %72, %82 : vector<40x128xf32>
    %c1 = arith.constant 1 : index
    %84 = memref.load %arg0[%c1] : memref<12xf32, #tpu.memory_space<smem>>
    %85 = vector.broadcast %84 : f32 to vector<40x128xf32>
    %86 = arith.select %26, %85, %58 : vector<40x128xi1>, vector<40x128xf32>
    %c5 = arith.constant 5 : index
    %87 = memref.load %arg0[%c5] : memref<12xf32, #tpu.memory_space<smem>>
    %88 = vector.broadcast %87 : f32 to vector<40x128xf32>
    %89 = arith.select %37, %88, %86 : vector<40x128xi1>, vector<40x128xf32>
    %c34_i32 = arith.constant 34 : i32
    %90 = tpu.dynamic_rotate %57 by %c34_i32 dim 0 : vector<40x128xf32>, i32 -> vector<40x128xf32>
    %91 = arith.mulf %90, %89 : vector<40x128xf32>
    %92 = arith.addf %83, %91 : vector<40x128xf32>
    %c2 = arith.constant 2 : index
    %93 = memref.load %arg0[%c2] : memref<12xf32, #tpu.memory_space<smem>>
    %94 = vector.broadcast %93 : f32 to vector<40x128xf32>
    %95 = arith.select %26, %94, %58 : vector<40x128xi1>, vector<40x128xf32>
    %c28_i32 = arith.constant 28 : i32
    %96 = tpu.dynamic_rotate %57 by %c28_i32 dim 0 : vector<40x128xf32>, i32 -> vector<40x128xf32>
    %97 = arith.mulf %96, %95 : vector<40x128xf32>
    %98 = arith.addf %92, %97 : vector<40x128xf32>
    %c9 = arith.constant 9 : index
    %99 = memref.load %arg0[%c9] : memref<12xf32, #tpu.memory_space<smem>>
    %100 = vector.broadcast %99 : f32 to vector<40x128xf32>
    %101 = arith.select %26, %100, %58 : vector<40x128xi1>, vector<40x128xf32>
    %c10 = arith.constant 10 : index
    %102 = memref.load %arg0[%c10] : memref<12xf32, #tpu.memory_space<smem>>
    %103 = vector.broadcast %102 : f32 to vector<40x128xf32>
    %104 = arith.select %37, %103, %101 : vector<40x128xi1>, vector<40x128xf32>
    %c11 = arith.constant 11 : index
    %105 = memref.load %arg0[%c11] : memref<12xf32, #tpu.memory_space<smem>>
    %106 = vector.broadcast %105 : f32 to vector<40x128xf32>
    %107 = arith.select %48, %106, %104 : vector<40x128xi1>, vector<40x128xf32>
    %108 = arith.addf %98, %107 : vector<40x128xf32>
    %109 = arith.andi %56, %52 : vector<40x128xi1>
    %cst_14 = arith.constant 0.000000e+00 : f32
    %110 = vector.broadcast %cst_14 : f32 to vector<40x128xf32>
    %111 = arith.select %109, %108, %110 : vector<40x128xi1>, vector<40x128xf32>
    %cst_15 = arith.constant dense<true> : vector<40x128xi1>
    %112 = arith.xori %52, %cst_15 : vector<40x128xi1>
    %113 = arith.andi %56, %112 : vector<40x128xi1>
    %cst_16 = arith.constant 0.000000e+00 : f32
    %114 = vector.broadcast %cst_16 : f32 to vector<40x128xf32>
    %115 = arith.select %113, %108, %114 : vector<40x128xi1>, vector<40x128xf32>
    %cst_17 = arith.constant dense<true> : vector<40x128xi1>
    %116 = arith.xori %56, %cst_17 : vector<40x128xi1>
    %117 = arith.andi %116, %54 : vector<40x128xi1>
    %cst_18 = arith.constant 0.000000e+00 : f32
    %118 = vector.broadcast %cst_18 : f32 to vector<40x128xf32>
    %119 = arith.select %117, %108, %118 : vector<40x128xi1>, vector<40x128xf32>
    %cst_19 = arith.constant dense<true> : vector<40x128xi1>
    %120 = arith.xori %56, %cst_19 : vector<40x128xi1>
    %cst_20 = arith.constant dense<true> : vector<40x128xi1>
    %121 = arith.xori %54, %cst_20 : vector<40x128xi1>
    %122 = arith.andi %120, %121 : vector<40x128xi1>
    %cst_21 = arith.constant 0.000000e+00 : f32
    %123 = vector.broadcast %cst_21 : f32 to vector<40x128xf32>
    %124 = arith.select %122, %108, %123 : vector<40x128xi1>, vector<40x128xf32>
    %c1_i32_22 = arith.constant 1 : i32
    %125 = tpu.dynamic_rotate %115 by %c1_i32_22 dim 1 : vector<40x128xf32>, i32 -> vector<40x128xf32>
    %c1_i32_23 = arith.constant 1 : i32
    %126 = tpu.dynamic_rotate %119 by %c1_i32_23 dim 0 : vector<40x128xf32>, i32 -> vector<40x128xf32>
    %c1_i32_24 = arith.constant 1 : i32
    %127 = tpu.dynamic_rotate %124 by %c1_i32_24 dim 1 : vector<40x128xf32>, i32 -> vector<40x128xf32>
    %c1_i32_25 = arith.constant 1 : i32
    %128 = tpu.dynamic_rotate %127 by %c1_i32_25 dim 0 : vector<40x128xf32>, i32 -> vector<40x128xf32>
    %129 = arith.select %10, %128, %126 : vector<40x128xi1>, vector<40x128xf32>
    %130 = arith.select %10, %125, %111 : vector<40x128xi1>, vector<40x128xf32>
    %131 = arith.select %6, %129, %130 : vector<40x128xi1>, vector<40x128xf32>
    %cst_26 = arith.constant 0.000000e+00 : f32
    %132 = vector.broadcast %cst_26 : f32 to vector<40x128xf32>
    %133 = arith.select %15, %131, %132 : vector<40x128xi1>, vector<40x128xf32>
    %c0_27 = arith.constant 0 : index
    %c0_28 = arith.constant 0 : index
    %134 = vector.load %arg2[%c0_27, %c0_28] : memref<40x128xf32, #tpu.memory_space<vmem>>, vector<40x128xf32>
    tpu.vector_store %arg2[%c0_27, %c0_28], %133 {strides = array<i32>} : memref<40x128xf32, #tpu.memory_space<vmem>>, vector<40x128xf32>,
    return
  }
}

</mosaic_0001>

<bundles_post_ra>
// kernel: tpu_custom_call.1
= control target key start
LH: loop header
LB: loop body
LE: loop exit
PB: predicated region body
PF: predicated region fallthrough
CT: control target
= control target key end

     0   :  { %7 = vsyncpa [#allocation5], 0  ;;  %s1489_s0 = inlined_call_operand.hbm [shape: f32[12], index: 0, kind: input, shape index: {}]   ;;  %s1490_s1 = inlined_call_operand.hbm [shape: f32[40,128], index: 1, kind: input, shape index: {}]   ;;  %s1491_s2 = inlined_call_operand.hbm [shape: f32[40,128], index: 2, kind: output, shape index: {}]  }
   0x1   :  { %8 = vsyncpa [#allocation3], 0 }
   0x2   :  { %9 = vsyncpa [#allocation4], 0  ;;  %s612_s9 = smov [#allocation2]   ;;  %s613_s12 = smov [#allocation6]  }
   0x3   :  { %17 = dma.hbm_to_smem %s1489_s0, 16, %s612_s9, [#allocation5]  }
   0x4   :  { %s23_s13 = sshll.u32 %s613_s12, 4  ;;  %s24_s13 = int_to_ptr.vmem [resolvable:$true] %s23_s13 }
   0x5   :  { %s574_s14 = scalar_lea.vmem %s24_s13, 640  ;;  %p579_p1 = scmp.lt.s32.totalorder %s24_s13, %s24_s13 }
   0x6   :  { %p575_p0 = scmp.ne.s32.totalorder %s24_s13, %s574_s14  ;;  %p580_p2 = scmp.lt.s32.totalorder %s574_s14, %s574_s14 }
   0x8   :  { %p581_p3 = por %p580_p2, %p579_p1 }
   0xa   :  { %p582_p4 = pnand %p581_p3, %p575_p0 }
   0xc   :  { %585 = shalt.err (!%p582_p4)
}
   0xd   :  { %s614_s15 = smov 128   ;;  %s615_s16 = smov 8  }
   0xe   :  { %29 = dma.hbm_to_vmem [thread:$0]  %s1490_s1, 640, %s24_s13, [#allocation3], %s614_s15, %s614_s15, %s615_s16  }
   0xf   :  { %606 = dma.done.wait [#allocation5], 16  }
  0x10   :  { %607 = vsyncadd [#allocation5], 4294967280 }
  0x11   :  { %608 = dma.done.wait [#allocation3], 640  }
  0x12   :  { %609 = vsyncadd [#allocation3], 4294966656 }
  0x13   :  { %36 = sfence }
  0x14   :  { %v644_v0 = vld [vmem:[#allocation6 + $0x10] sm:$0xff]  ;;  %v646_v1 = vld [vmem:[#allocation6] sm:$0xff]  ;;  %s616_s0 = smov 127   ;;  %v650_v2 = vld [vmem:[#allocation6 + $0x18] sm:$0xff]  ;;  %v1495_v5 = vlaneseq  ;;  %s539_s1 = sld [smem:[#allocation2 + $0x6]] }
  0x15   :  { %1561 = vst [vmem:[#allocation11_spill] sm:$0xff] %v644_v0  ;;  %1562 = vst [vmem:[#allocation12_spill] sm:$0xff] %v646_v1  ;;  %177 = vrot.lane.b32.xlu1 %v644_v0, %s616_s0  ;;  %173 = vrot.lane.b32.xlu0 %v646_v1, %s616_s0  ;;  %v652_v3 = vld [vmem:[#allocation6 + $0x8] sm:$0xff]  ;;  %v656_v4 = vld [vmem:[#allocation6 + $0x20] sm:$0xff]  ;;  %s540_s19 = sld [smem:[#allocation2 + $0x3]]  ;;  %v185_v7 = vrot.slane %v644_v0, 1 }
  0x16   :  { %1563 = vst [vmem:[#allocation13_spill] sm:$0xff] %v650_v2  ;;  %1564 = vst [vmem:[#allocation14_spill] sm:$0xff] %v652_v3  ;;  %v660_v6 = vshrl.u32 %v1495_v5, 7  ;;  %s542_s20 = sld [smem:[#allocation2 + $0x4]]  ;;  %v186_v8 = vrot.slane %v650_v2, 1  ;;  %v184_v10 = vrot.slane %v652_v3, 1 }
  0x17   :  { %1565 = vst [vmem:[#allocation15_spill] sm:$0xff] %v656_v4  ;;  %s541_s21 = sld [smem:[#allocation2 + $0x7]]  ;;  %v187_v11 = vrot.slane %v656_v4, 1  ;;  %v183_v13 = vrot.slane %v646_v1, 1  ;;  %s618_s30 = smov 1  }
  0x18   :  { %s662_s22 = sld [smem:[#allocation2 + $0x8]]  ;;  %vm188_vm0 = vcmp.lt.s32.totalorder %v660_v6, 7  ;;  %v670_v9 = vadd.s32 8, %v660_v6  ;;  %v677_v12 = vadd.s32 24, %v660_v6  ;;  %vm78_vm1 = vcmp.lt.s32.totalorder %v660_v6, 6  ;;  %s619_s3 = smov [#allocation7]  }
  0x19   :  { %179 = vrot.lane.b32.xlu1 %v650_v2, %s616_s0  ;;  %175 = vrot.lane.b32.xlu0 %v652_v3, %s616_s0  ;;  %s666_s23 = sld [smem:[#allocation2 + $0x5]]  ;;  %v684_v14 = vsel %vm188_vm0, %v185_v7, %v186_v8  ;;  %v688_v16 = vadd.s32 32, %v660_v6  ;;  %v698_v19 = vsel %vm188_vm0, %v184_v10, %v185_v7  ;;  %v707_v21 = vsel %vm188_vm0, %v186_v8, %v187_v11  ;;  %s526_s4 = sshll.u32 %s619_s3, 4  ;;  %s527_s4 = int_to_ptr.vmem [resolvable:$true] %s526_s4 }
  0x1a   :  { %1566 = vst [vmem:[#allocation16_spill] sm:$0xff] %v670_v9  ;;  %s672_s24 = sld [smem:[#allocation2]]  ;;  %1567 = vst [vmem:[#allocation17_spill] sm:$0xff] %v677_v12  ;;  %vm114_vm2 = vcmp.lt.s32.totalorder %v670_v9, 12  ;;  %vm144_vm3 = vcmp.ge.s32.totalorder %v670_v9, 12  ;;  %v235_v17 = vstv %s539_s1  ;;  %vm131_vm4 = vcmp.lt.s32.totalorder %v677_v12, 30  ;;  %p591_p6 = scmp.lt.s32.totalorder %s527_s4, %s527_s4 }
  0x1b   :  { %s679_s25 = sld [smem:[#allocation2 + $0x1]]  ;;  %v258_v15 = vstv %s540_s19  ;;  %1568 = vst [vmem:[#allocation18_spill] sm:$0xff] %v688_v16  ;;  %v702_v20 = vsel %vm144_vm3, %v235_v17, 0.0  ;;  %v715_v24 = vsel %vm188_vm0, %v187_v11, %v183_v13  ;;  %v718_v25 = vadd.s32 16, %v660_v6  ;;  %s586_s5 = scalar_lea.vmem %s527_s4, 640 }
  0x1c   :  { %s690_s26 = sld [smem:[#allocation2 + $0x2]]  ;;  %v299_v18 = vstv %s542_s20  ;;  %v260_v22 = vsel %vm114_vm2, %v258_v15, 0.0  ;;  %vm1494_vm5 = vcmp.lt.s32.totalorder %v688_v16, 36  ;;  %vm108_vm6 = vcmp.ge.s32.totalorder %v660_v6, 6  ;;  %p587_p5 = scmp.ne.s32.totalorder %s527_s4, %s586_s5 }
  0x1d   :  { %181 = vrot.lane.b32.xlu0 %v656_v4, %s616_s0  ;;  %s694_s27 = sld [smem:[#allocation2 + $0x9]]  ;;  %v265_v23 = vstv %s541_s21  ;;  %1569 = vst [vmem:[#allocation19_spill] sm:$0xff] %v718_v25  ;;  %v301_v26 = vsel %vm114_vm2, %v299_v18, 0.0  ;;  %v727_v28 = vsel %vm1494_vm5, %v235_v17, 0.0  ;;  %v731_v29 = vsel %vm188_vm0, %v183_v13, %v184_v10  ;;  %p592_p7 = scmp.lt.s32.totalorder %s586_s5, %s586_s5 }
  0x1e   :  { %s709_s28 = sld [smem:[#allocation2 + $0xa]]  ;;  %v306_v27 = vstv %s662_s22  ;;  %vm161_vm7 = vcmp.ge.s32.totalorder %v677_v12, 30  ;;  %v737_v31 = vsel %vm144_vm3, %v265_v23, %v260_v22  ;;  %v742_v33 = vsel %vm1494_vm5, %v265_v23, 0.0 }
  0x1f   :  { %v330_v32 = vstv %s666_s23  ;;  %s745_s29 = sld [smem:[#allocation2 + $0xb]]  ;;  %v749_v35 = vsel %vm144_vm3, %v306_v27, %v301_v26  ;;  %v753_v36 = vsel %vm108_vm6, %v258_v15, 0.0  ;;  %v303_v37 = vsel %vm131_vm4, %v299_v18, 0.0  ;;  %p593_p8 = por %p592_p7, %p591_p6 }
  0x20   :  { %v292_v30 = vstv %s672_s24  ;;  %vm90_vm8 = vcmp.ge.s32.totalorder %v718_v25, 18  ;;  %v760_v38 = vsel %vm1494_vm5, %v306_v27, 0.0  ;;  %v766_v40 = vsel %vm161_vm7, %v235_v17, 0.0 }
  0x21   :  { %v323_v34 = vstv %s679_s25  ;;  %v293_v39 = vsel %vm78_vm1, %v292_v30, 0.0  ;;  %v262_v41 = vsel %vm131_vm4, %v258_v15, 0.0  ;;  %v772_v42 = vsel %vm114_vm2, %v330_v32, 0.0  ;;  %p594_p9 = pnand %p593_p8, %p587_p5 }
  0x22   :  { %v776_v43 = vsel %vm131_vm4, %v330_v32, 0.0  ;;  %v324_v44 = vsel %vm78_vm1, %v323_v34, 0.0  ;;  %v358_v45 = vstv %s690_s26  ;;  %vm1512_vm9 = vcmp.lt.s32.totalorder %v718_v25, 18 }
  0x23   :  { %v375_v48 = vstv %s694_s27  ;;  %v295_v50 = vsel %vm90_vm8, %v292_v30, 0.0  ;;  %v792_v51 = vsel %vm108_vm6, %v299_v18, %v293_v39  ;;  %v798_v53 = vsel %vm161_vm7, %v265_v23, %v262_v41 }
  0x24   :  { %v382_v49 = vstv %s709_s28  ;;  %v376_v52 = vsel %vm78_vm1, %v375_v48, 0.0  ;;  %v802_v54 = vsel %vm161_vm7, %v306_v27, %v303_v37  ;;  %v806_v55 = vsel %vm108_vm6, %v330_v32, %v324_v44 }
  0x25   :  { %v810_v56 = vsel %vm78_vm1, %v358_v45, 0.0  ;;  %v814_v57 = vsel %vm1512_vm9, %v235_v17, 0.0  ;;  %v818_v58 = vsel %vm1512_vm9, %v265_v23, 0.0  ;;  %v384_v60 = vsel %vm114_vm2, %v382_v49, 0.0 }
  0x26   :  { %v827_v61 = vsel %vm1512_vm9, %v306_v27, %v295_v50  ;;  %v835_v7 = vsel %vm108_vm6, %v382_v49, %v376_v52  ;;  %v838_v8 = vstv %s745_s29  ;;  %v842_v10 = vsel %vm90_vm8, %v323_v34, 0.0 }
  0x27   :  { %1574 = vst [vmem:[#allocation24_spill] sm:$0xff] %v835_v7  ;;  %1575 = vst [vmem:[#allocation25_spill] sm:$0xff] %v838_v8  ;;  %v846_v11 = vsel %vm90_vm8, %v358_v45, 0.0  ;;  %vm246_vm13 = vcmp.lt.s32.totalorder %v660_v6, 4  ;;  %v866_v22 = vsel %vm144_vm3, %v838_v8, %v384_v60  ;;  %v386_v23 = vsel %vm131_vm4, %v382_v49, 0.0 }
  0x28   :  { %1576 = vst [vmem:[#allocation26_spill] sm:$0xff] %v846_v11  ;;  %1577 = vst [vmem:[#allocation27_spill] sm:$0xff] %v866_v22  ;;  %vm341_vm15 = vcmp.lt.s32.totalorder %v660_v6, 2  ;;  %v931_v45 = vsel %vm161_vm7, %v838_v8, %v386_v23  ;;  %vm1559_vm7 = vmmov 1   ;;  %v1588_v23 = vmov 0 }
  0x29   :  { %1583 = vst [vmem:[#allocation33_spill] sm:$0xff] %v931_v45 }
  0x87   :  { %v781_v46 = vpop.permute.xlu1 %177  ;;  %v783_v47 = vpop.permute.xlu0 %173 }
  0x88   :  { %1570 = vst [vmem:[#allocation20_spill] sm:$0xff] %v781_v46  ;;  %1571 = vst [vmem:[#allocation21_spill] sm:$0xff] %v783_v47  ;;  %v196_v59 = vrot.slane %v781_v46, 1  ;;  %vm1492_vm10 = vcmp.ge.f32.partialorder %v644_v0, %v781_v46  ;;  %v194_v13 = vrot.slane %v783_v47, 1  ;;  %vm1507_vm12 = vcmp.ge.f32.partialorder %v646_v1, %v783_v47 }
  0x89   :  { %v858_v18 = vsel %vm1492_vm10, %v644_v0, %v781_v46 }
  0x8b   :  { %v829_v62 = vpop.permute.xlu1 %179  ;;  %v831_v63 = vpop.permute.xlu0 %175 }
  0x8c   :  { %1572 = vst [vmem:[#allocation22_spill] sm:$0xff] %v829_v62  ;;  %1573 = vst [vmem:[#allocation23_spill] sm:$0xff] %v831_v63  ;;  %v197_v15 = vrot.slane %v829_v62, 1  ;;  %v195_v17 = vrot.slane %v831_v63, 1  ;;  %vm1493_vm11 = vcmp.ge.f32.partialorder %v652_v3, %v831_v63  ;;  %vm1501_vm14 = vcmp.ge.f32.partialorder %v650_v2, %v829_v62 }
  0x8d   :  { %v892_v32 = vsel %vm1493_vm11, %v652_v3, %v831_v63 }
  0x8e   :  { %v872_v26 = vsel %vm188_vm0, %v196_v59, %v197_v15  ;;  %v879_v27 = vsel %vm188_vm0, %v195_v17, %v196_v59  ;;  %v883_v30 = vsel %vm188_vm0, %v194_v13, %v195_v17  ;;  %1578 = vst [vmem:[#allocation28_spill] sm:$0xff] %v892_v32 }
  0x8f   :  { %vm1557_vm2 = vcmp.ge.f32.partialorder %v684_v14, %v872_v26  ;;  %vm1516_vm3 = vcmp.ge.f32.partialorder %v698_v19, %v879_v27  ;;  %v896_v34 = vpop.permute.xlu0 %181  ;;  %vm1537_vm4 = vcmp.ge.f32.partialorder %v731_v29, %v883_v30 }
  0x90   :  { %1579 = vst [vmem:[#allocation29_spill] sm:$0xff] %v896_v34  ;;  %v905_v37 = vsel %vm1557_vm2, %v684_v14, %v872_v26  ;;  %v912_v39 = vsel %vm1516_vm3, %v698_v19, %v879_v27  ;;  %v198_v41 = vrot.slane %v896_v34, 1  ;;  %vm1498_vm6 = vcmp.ge.f32.partialorder %v656_v4, %v896_v34 }
  0x91   :  { %1580 = vst [vmem:[#allocation30_spill] sm:$0xff] %v905_v37  ;;  %1581 = vst [vmem:[#allocation31_spill] sm:$0xff] %v912_v39  ;;  %vm1555_vm10 = vcmp.ge.f32.partialorder %v858_v18, %v905_v37  ;;  %vm1506_vm11 = vcmp.ge.f32.partialorder %v892_v32, %v912_v39  ;;  %v926_v44 = vsel %vm1537_vm4, %v731_v29, %v883_v30 }
  0x92   :  { %1582 = vst [vmem:[#allocation32_spill] sm:$0xff] %v926_v44  ;;  %v938_v49 = vsel %vm1555_vm10, %v858_v18, %v905_v37  ;;  %v945_v50 = vsel %vm1506_vm11, %v892_v32, %v912_v39  ;;  %v949_v52 = vsel %vm188_vm0, %v197_v15, %v198_v41  ;;  %v953_v59 = vsel %vm188_vm0, %v198_v41, %v194_v13  ;;  %vm959_vm5 = vmxor %vm1506_vm11, %vm1559_vm7 }
  0x93   :  { %v968_v15 = vsel %vm1507_vm12, %v646_v1, %v783_v47  ;;  %v975_v13 = vsel %vm1501_vm14, %v650_v2, %v829_v62  ;;  %v982_v17 = vsel %vm1498_vm6, %v656_v4, %v896_v34  ;;  %vm989_vm0 = vmand %vm959_vm5, %vm1516_vm3  ;;  %v995_v41 = vsel %vm90_vm8, %v375_v48, 0.0 }
  0x94   :  { %1586 = vst [vmem:[#allocation34_spill] sm:$0xff] %v968_v15  ;;  %1587 = vst [vmem:[#allocation35_spill] sm:$0xff] %v975_v13  ;;  %v1589_v23 = vsel %vm989_vm0, 4294967295, %v1588_v23  ;;  %v243_v5 = vrot.slane %v938_v49, 4  ;;  %v242_v9 = vrot.slane %v945_v50, 4  ;;  %vm1550_vm6 = vcmp.ge.f32.partialorder %v707_v21, %v949_v52 }
  0x95   :  { %1590 = vst [vmem:[#allocation36_spill] sm:$0xff] %v1589_v23  ;;  %v337_v34 = vrot.slane %v945_v50, 6  ;;  %vm1556_vm14 = vcmp.ge.f32.partialorder %v715_v24, %v953_v59  ;;  %v1010_v48 = vsel %vm1550_vm6, %v707_v21, %v949_v52  ;;  %vm1531_vm8 = vcmp.ge.f32.partialorder %v968_v15, %v926_v44 }
  0x96   :  { %1591 = vst [vmem:[#allocation37_spill] sm:$0xff] %v1010_v48  ;;  %v273_v12 = vrot.slane %v938_v49, 2  ;;  %v272_v4 = vrot.slane %v945_v50, 2  ;;  %v1021_v62 = vsel %vm1556_vm14, %v715_v24, %v953_v59  ;;  %vm1548_vm11 = vcmp.ge.f32.partialorder %v975_v13, %v1010_v48  ;;  %vm1029_vm12 = vmxor %vm1531_vm8, %vm1559_vm7 }
  0x97   :  { %v1592_v2 = vmov 0  ;;  %v313_v46 = vmul.f32 %v749_v35, %v945_v50  ;;  %vm1554_vm9 = vcmp.ge.f32.partialorder %v982_v17, %v1021_v62  ;;  %v232_v0 = vsel %vm1548_vm11, %v975_v13, %v1010_v48  ;;  %vm1054_vm3 = vmand %vm1029_vm12, %vm1537_vm4 }
  0x98   :  { %v1593_v2 = vsel %vm1029_vm12, 4294967295, %v1592_v2  ;;  %v1047_v23 = vsel %vm1531_vm8, %v968_v15, %v926_v44  ;;  %v1595_v35 = vmov 0  ;;  %v249_v50 = vsel %vm246_vm13, %v242_v9, %v243_v5  ;;  %vm1073_vm8 = vmxor %vm1548_vm11, %vm1559_vm7 }
  0x99   :  { %1594 = vst [vmem:[#allocation38_spill] sm:$0xff] %v1593_v2  ;;  %v1596_v35 = vsel %vm1054_vm3, 4294967295, %v1595_v35  ;;  %v233_v39 = vsel %vm1554_vm9, %v982_v17, %v1021_v62  ;;  %v244_v32 = vrot.slane %v232_v0, 4  ;;  %v274_v63 = vrot.slane %v232_v0, 2  ;;  %vm1086_vm4 = vmand %vm1073_vm8, %vm1550_vm6 }
  0x9a   :  { %1597 = vst [vmem:[#allocation39_spill] sm:$0xff] %v1596_v35  ;;  %v1598_v3 = vrot.slane %v938_v49, 6  ;;  %v245_v44 = vrot.slane %v233_v39, 4  ;;  %v275_v15 = vrot.slane %v233_v39, 2  ;;  %v339_v47 = vrot.slane %v232_v0, 6  ;;  %vm1105_vm11 = vmxor %vm1555_vm10, %vm1559_vm7 }
  0x9b   :  { %v1599_v1 = vmov 0  ;;  %v248_v22 = vsel %vm246_vm13, %v243_v5, %v244_v32  ;;  %v340_v16 = vrot.slane %v233_v39, 6  ;;  %v271_v35 = vrot.slane %v1047_v23, 2  ;;  %vm1119_vm6 = vmand %vm1105_vm11, %vm1557_vm2 }
  0x9c   :  { %v344_v45 = vsel %vm341_vm15, %v337_v34, %v1598_v3  ;;  %v1600_v1 = vsel %vm1073_vm8, 4294967295, %v1599_v1  ;;  %v336_v11 = vrot.slane %v1047_v23, 6  ;;  %v1602_v3 = vmov 0 }
  0x9d   :  { %1601 = vst [vmem:[#allocation40_spill] sm:$0xff] %v1600_v1  ;;  %v1603_v3 = vsel %vm1086_vm4, 4294967295, %v1602_v3  ;;  %v278_v48 = vsel %vm78_vm1, %v272_v4, %v273_v12  ;;  %v247_v5 = vsel %vm246_vm13, %v244_v32, %v245_v44  ;;  %v256_v13 = vmul.f32 %v248_v22, %v727_v28 }
  0x9e   :  { %1604 = vst [vmem:[#allocation41_spill] sm:$0xff] %v1603_v3  ;;  %v276_v2 = vsel %vm78_vm1, %v274_v63, %v275_v15  ;;  %v348_v7 = vmul.f32 %v344_v45, %v772_v42  ;;  %v252_v25 = vmul.f32 0.0, %v247_v5  ;;  %v280_v8 = vsel %vm78_vm1, %v275_v15, %v271_v35 }
  0x9f   :  { %v285_v1 = vmul.f32 %v276_v2, %v742_v33  ;;  %v316_v28 = vmul.f32 %v760_v38, %v233_v39  ;;  %v281_v32 = vmul.f32 %v280_v8, %v753_v36  ;;  %v345_v42 = vsel %vm341_vm15, %v336_v11, %v337_v34 }
  0xa0   :  { %v241_v2 = vrot.slane %v1047_v23, 4  ;;  %v1607_v33 = vmov 0  ;;  %v342_v38 = vsel %vm341_vm15, %v339_v47, %v340_v16  ;;  %v312_v36 = vmul.f32 %v792_v51, %v1047_v23 }
  0xa1   :  { %v1608_v33 = vsel %vm1119_vm6, 4294967295, %v1607_v33  ;;  %v290_v45 = vadd.f32 %v285_v1, %v256_v13  ;;  %v279_v8 = vsel %vm78_vm1, %v271_v35, %v272_v4  ;;  %v286_v34 = vadd.f32 %v281_v32, %v252_v25 }
  0xa2   :  { %1609 = vst [vmem:[#allocation42_spill] sm:$0xff] %v1608_v33  ;;  %v364_v39 = vmul.f32 %v810_v56, %v249_v50  ;;  %v250_v15 = vsel %vm246_vm13, %v241_v2, %v242_v9  ;;  %v251_v37 = vsel %vm246_vm13, %v245_v44, %v241_v2  ;;  %v347_v1 = vmul.f32 %v345_v42, %v806_v55  ;;  %vm1145_vm13 = vmxor %vm1554_vm9, %vm1559_vm7 }
  0xa3   :  { %v253_v13 = vmul.f32 %v251_v37, %v702_v20  ;;  %v282_v33 = vmul.f32 %v279_v8, %v737_v31  ;;  %v277_v51 = vsel %vm78_vm1, %v273_v12, %v274_v63  ;;  %v321_v23 = vadd.f32 %v316_v28, %v290_v45  ;;  %vm1157_vm1 = vmand %vm1145_vm13, %vm1556_vm14  ;;  %v1627_v28 = vld [vmem:[#allocation24_spill] sm:$0xff] }
  0xa4   :  { %v317_v4 = vadd.f32 %v312_v36, %v286_v34  ;;  %v255_v25 = vmul.f32 %v249_v50, %v766_v40  ;;  %v284_v56 = vmul.f32 %v277_v51, %v798_v53  ;;  %v1610_v9 = vmov 0  ;;  %v1638_v51 = vld [vmem:[#allocation21_spill] sm:$0xff] }
  0xa5   :  { %v1611_v9 = vsel %vm1145_vm13, 4294967295, %v1610_v9  ;;  %v287_v20 = vadd.f32 %v282_v33, %v253_v13  ;;  %v315_v31 = vmul.f32 %v802_v54, %v232_v0  ;;  %v254_v55 = vmul.f32 %v250_v15, %v814_v57  ;;  %v1629_v33 = vld [vmem:[#allocation26_spill] sm:$0xff]  ;;  %v1637_v13 = vld [vmem:[#allocation12_spill] sm:$0xff]  ;;  %v1650_v0 = vld [vmem:[#allocation31_spill] sm:$0xff] }
  0xa6   :  { %v283_v12 = vmul.f32 %v278_v48, %v818_v58  ;;  %v352_v53 = vadd.f32 %v347_v1, %v317_v4  ;;  %vm1614_vm9 = vcmp.ge.f32.partialorder %v731_v29, %v883_v30  ;;  %v289_v54 = vadd.f32 %v284_v56, %v255_v25  ;;  %v1641_v4 = vld [vmem:[#allocation32_spill] sm:$0xff]  ;;  %v1645_v56 = vld [vmem:[#allocation33_spill] sm:$0xff] }
  0xa7   :  { %vm1165_vm10 = vmxor %vm1614_vm9, %vm1559_vm7  ;;  %v314_v57 = vmul.f32 %v827_v61, %v938_v49  ;;  %v1617_v58 = vrot.slane %v938_v49, 6  ;;  %v318_v44 = vadd.f32 %v313_v46, %v287_v20  ;;  %vm1618_vm14 = vcmp.ge.f32.partialorder %v698_v19, %v879_v27 }
  0xa8   :  { %vm1179_vm2 = vmxor %vm1618_vm14, %vm1559_vm7  ;;  %v288_v30 = vadd.f32 %v283_v12, %v254_v55  ;;  %v346_v61 = vsel %vm341_vm15, %v340_v16, %v336_v11  ;;  %v350_v49 = vmul.f32 %v342_v38, %v776_v43  ;;  %v369_v35 = vadd.f32 %v364_v39, %v352_v53  ;;  %v1624_v43 = vld [vmem:[#allocation25_spill] sm:$0xff]  ;;  %v1625_v11 = vld [vmem:[#allocation19_spill] sm:$0xff] }
  0xa9   :  { %v343_v63 = vsel %vm341_vm15, %v1617_v58, %v339_v47  ;;  %v320_v46 = vadd.f32 %v315_v31, %v289_v54  ;;  %v351_v19 = vmul.f32 0.0, %v346_v61  ;;  %v353_v47 = vadd.f32 %v348_v7, %v318_v44  ;;  %vm445_vm9 = vmand %vm1029_vm12, %vm1165_vm10  ;;  %v1646_v55 = vld [vmem:[#allocation14_spill] sm:$0xff]  ;;  %v1647_v12 = vld [vmem:[#allocation23_spill] sm:$0xff] }
  0xaa   :  { %v349_v48 = vmul.f32 %v343_v63, %v842_v10  ;;  %v365_v27 = vmul.f32 0.0, %v248_v22  ;;  %vm1621_vm14 = vcmp.ge.f32.partialorder %v707_v21, %v949_v52  ;;  %v319_v16 = vadd.f32 %v314_v57, %v288_v30  ;;  %v1649_v53 = vld [vmem:[#allocation28_spill] sm:$0xff] }
  0xab   :  { %vm1195_vm13 = vmxor %vm1621_vm14, %vm1559_vm7  ;;  %vm1626_vm15 = vcmp.lt.s32.totalorder %v1625_v11, 18  ;;  %v1204_v32 = vadd.f32 %v1627_v28, %v369_v35  ;;  %v355_v22 = vadd.f32 %v350_v49, %v320_v46  ;;  %v367_v21 = vmul.f32 0.0, %v251_v37  ;;  %v1657_v61 = vld [vmem:[#allocation20_spill] sm:$0xff]  ;;  %v1659_v49 = vld [vmem:[#allocation30_spill] sm:$0xff] }
  0xac   :  { %v392_v50 = vsel %vm1626_vm15, %v1624_v43, %v995_v41  ;;  %v356_v52 = vadd.f32 %v351_v19, %v321_v23  ;;  %v370_v42 = vadd.f32 %v365_v27, %v353_v47  ;;  %v354_v2 = vadd.f32 %v349_v48, %v319_v16  ;;  %v1640_v23 = vld [vmem:[#allocation34_spill] sm:$0xff]  ;;  %v1656_v48 = vld [vmem:[#allocation11_spill] sm:$0xff]  ;;  %v1664_v47 = vld [vmem:[#allocation13_spill] sm:$0xff] }
  0xad   :  { %v366_v45 = vmul.f32 %v1629_v33, %v247_v5  ;;  %vm1630_vm14 = vcmp.ge.f32.partialorder %v684_v14, %v872_v26  ;;  %v368_v38 = vmul.f32 0.0, %v250_v15  ;;  %v450_v36 = vsel %vm445_vm9, %v1204_v32, 0.0  ;;  %v1634_v5 = vld [vmem:[#allocation18_spill] sm:$0xff]  ;;  %v1636_v26 = vld [vmem:[#allocation27_spill] sm:$0xff] }
  0xae   :  { %vm1215_vm15 = vmxor %vm1630_vm14, %vm1559_vm7  ;;  %v435_v37 = vsel %vm1054_vm3, %v1204_v32, 0.0  ;;  %v372_v34 = vadd.f32 %v367_v21, %v355_v22  ;;  %vm1635_vm12 = vcmp.lt.s32.totalorder %v1634_v5, 36  ;;  %476 = vrot.lane.b32.xlu1 %v450_v36, %s618_s30  ;;  %v1232_v39 = vadd.f32 %v1636_v26, %v370_v42  ;;  %v1665_v27 = vld [vmem:[#allocation22_spill] sm:$0xff]  ;;  %v1667_v16 = vld [vmem:[#allocation35_spill] sm:$0xff] }
  0xaf   :  { %v394_v14 = vsel %vm1635_vm12, %v1624_v43, 0.0  ;;  %v371_v15 = vadd.f32 %v366_v45, %v354_v2  ;;  %v373_v1 = vadd.f32 %v368_v38, %v356_v52  ;;  %vm1639_vm3 = vcmp.ge.f32.partialorder %v1637_v13, %v1638_v51  ;;  %v1668_v43 = vld [vmem:[#allocation37_spill] sm:$0xff]  ;;  %v1674_v52 = vld [vmem:[#allocation15_spill] sm:$0xff] }
  0xb0   :  { %vm1642_vm9 = vcmp.ge.f32.partialorder %v1640_v23, %v1641_v4  ;;  %v1245_v20 = vadd.f32 %v1645_v56, %v372_v34  ;;  %vm1648_vm12 = vcmp.ge.f32.partialorder %v1646_v55, %v1647_v12  ;;  %vm1651_vm7 = vcmp.ge.f32.partialorder %v1649_v53, %v1650_v0  ;;  %v1675_v42 = vld [vmem:[#allocation29_spill] sm:$0xff] }
  0xb1   :  { %vm1240_vm14 = vmand %vm1642_vm9, %vm1639_vm3  ;;  %v436_v63 = vsel %vm989_vm0, %v1232_v39, 0.0  ;;  %v1269_v44 = vadd.f32 %v392_v50, %v371_v15  ;;  %v1271_v30 = vadd.f32 %v394_v14, %v373_v1  ;;  %vm1660_vm9 = vcmp.ge.f32.partialorder %v858_v18, %v1659_v49 }
  0xb2   :  { %v405_v31 = vsel %vm1240_vm14, %v1204_v32, 0.0  ;;  %vm1256_vm10 = vmand %vm1651_vm7, %vm1648_vm12  ;;  %vm1658_vm7 = vcmp.ge.f32.partialorder %v1656_v48, %v1657_v61  ;;  %v465_v29 = vrot.slane %v435_v37, 7  ;;  %v466_v35 = vrot.slane %v436_v63, 7 }
  0xb3   :  { %vm1654_vm3 = vmand %vm959_vm5, %vm1179_vm2  ;;  %v438_v19 = vsel %vm1086_vm4, %v1245_v20, 0.0  ;;  %vm1666_vm5 = vcmp.ge.f32.partialorder %v1664_v47, %v1665_v27  ;;  %vm1669_vm2 = vcmp.ge.f32.partialorder %v1667_v16, %v1668_v43  ;;  %v437_v22 = vsel %vm1119_vm6, %v1269_v44, 0.0 }
  0xb4   :  { %v451_v57 = vsel %vm1654_vm3, %v1232_v39, 0.0  ;;  %vm1279_vm12 = vmand %vm1660_vm9, %vm1658_vm7  ;;  %v439_v21 = vsel %vm1157_vm1, %v1271_v30, 0.0  ;;  %vm470_vm4 = vcmp.lt.s32.totalorder %v660_v6, 1  ;;  %vm1676_vm7 = vcmp.ge.f32.partialorder %v1674_v52, %v1675_v42 }
  0xb5   :  { %478 = vrot.lane.b32.xlu0 %v451_v57, %s618_s30  ;;  %vm1293_vm0 = vmand %vm1669_vm2, %vm1666_vm5  ;;  %vm1677_vm9 = vcmp.ge.f32.partialorder %v982_v17, %v1021_v62  ;;  %v468_v33 = vrot.slane %v438_v19, 7  ;;  %v469_v40 = vrot.slane %v439_v21, 7  ;;  %v467_v41 = vrot.slane %v437_v22, 7  ;;  %v1695_v57 = vld [vmem:[#allocation16_spill] sm:$0xff]  ;;  %v1698_v19 = vld [vmem:[#allocation17_spill] sm:$0xff] }
  0xb6   :  { %vm1672_vm3 = vmand %vm1105_vm11, %vm1215_vm15  ;;  %vm1681_vm6 = vmmov 1   ;;  %vm1682_vm1 = vcmp.ge.f32.partialorder %v715_v24, %v953_v59  ;;  %vm1683_vm2 = vnez %v1611_v9  ;;  %v406_v38 = vsel %vm1256_vm10, %v1232_v39, 0.0 }
  0xb7   :  { %v452_v28 = vsel %vm1672_vm3, %v1269_v44, 0.0  ;;  %vm1316_vm5 = vmand %vm1677_vm9, %vm1676_vm7  ;;  %v475_v10 = vsel %vm470_vm4, %v469_v40, %v465_v29  ;;  %v1340_v36 = vsel %vm470_vm4, %v465_v29, %v466_v35  ;;  %v1349_v59 = vsel %vm470_vm4, %v466_v35, %v467_v41 }
  0xb8   :  { %vm448_vm11 = vmand %vm1073_vm8, %vm1195_vm13  ;;  %480 = vrot.lane.b32.xlu1 %v452_v28, %s618_s30  ;;  %vm1684_vm8 = vcmp.ge.f32.partialorder %v1637_v13, %v1638_v51  ;;  %v407_v9 = vsel %vm1279_vm12, %v1269_v44, 0.0  ;;  %vm1685_vm10 = vcmp.ge.f32.partialorder %v1640_v23, %v1641_v4  ;;  %v408_v8 = vsel %vm1293_vm0, %v1245_v20, 0.0 }
  0xb9   :  { %v453_v45 = vsel %vm448_vm11, %v1245_v20, 0.0  ;;  %vm444_vm15 = vmxor %vm1682_vm1, %vm1681_vm6  ;;  %v1363_v37 = vsel %vm470_vm4, %v467_v41, %v468_v33  ;;  %vm1686_vm9 = vcmp.ge.f32.partialorder %v1646_v55, %v1647_v12  ;;  %v409_v14 = vsel %vm1316_vm5, %v1271_v30, 0.0 }
  0xba   :  { %482 = vrot.lane.b32.xlu0 %v453_v45, %s618_s30  ;;  %vm449_vm3 = vmand %vm1683_vm2, %vm444_vm15  ;;  %v1375_v26 = vsel %vm470_vm4, %v468_v33, %v469_v40  ;;  %vm1687_vm1 = vcmp.ge.f32.partialorder %v1649_v53, %v1650_v0  ;;  %vm1688_vm2 = vcmp.ge.f32.partialorder %v1656_v48, %v1657_v61  ;;  %v1694_v23 = vlaneseq }
  0xbb   :  { %vm410_vm13 = vmxor %vm1684_vm8, %vm1681_vm6  ;;  %v454_v24 = vsel %vm449_vm3, %v1271_v30, 0.0  ;;  %vm1689_vm8 = vcmp.ge.f32.partialorder %v858_v18, %v1659_v49  ;;  %v50_v54 = vand.u32 1, %v660_v6  ;;  %v51_v58 = vand.u32 1, %v1695_v57 }
  0xbc   :  { %vm415_vm7 = vmand %vm1685_vm10, %vm410_vm13  ;;  %484 = vrot.lane.b32.xlu1 %v454_v24, %s618_s30  ;;  %vm1690_vm10 = vcmp.ge.f32.partialorder %v1664_v47, %v1665_v27  ;;  %v49_v4 = vand.u32 127, %v1694_v23  ;;  %v53_v47 = vand.u32 1, %v1698_v19 }
  0xbd   :  { %v420_v34 = vsel %vm415_vm7, %v1204_v32, 0.0  ;;  %vm411_vm11 = vmxor %vm1686_vm9, %vm1681_vm6  ;;  %vm1691_vm9 = vcmp.ge.f32.partialorder %v1667_v16, %v1668_v43  ;;  %v54_v32 = vand.u32 1, %v1634_v5 }
  0xbe   :  { %455 = vrot.lane.b32.xlu0 %v420_v34, %s618_s30  ;;  %vm416_vm15 = vmand %vm1687_vm1, %vm411_vm11  ;;  %vm1692_vm1 = vcmp.ge.f32.partialorder %v1674_v52, %v1675_v42  ;;  %v60_v0 = vand.u32 1, %v49_v4  ;;  %vm58_vm14 = vcmp.eq.s32.totalorder %v53_v47, 1 }
  0xbf   :  { %v421_v15 = vsel %vm416_vm15, %v1232_v39, 0.0  ;;  %vm412_vm3 = vmxor %vm1688_vm2, %vm1681_vm6  ;;  %vm1693_vm2 = vcmp.ge.f32.partialorder %v982_v17, %v1021_v62  ;;  %v52_v17 = vand.u32 1, %v1625_v11  ;;  %vm59_vm12 = vcmp.eq.s32.totalorder %v54_v32, 1 }
  0xc0   :  { %457 = vrot.lane.b32.xlu1 %v421_v15, %s618_s30  ;;  %vm417_vm13 = vmand %vm1689_vm8, %vm412_vm3  ;;  %vm55_vm8 = vcmp.eq.s32.totalorder %v50_v54, 1 }
  0xc1   :  { %v422_v1 = vsel %vm417_vm13, %v1269_v44, 0.0  ;;  %vm413_vm7 = vmxor %vm1690_vm10, %vm1681_vm6  ;;  %vm56_vm13 = vcmp.eq.s32.totalorder %v51_v58, 1  ;;  %vm62_vm10 = vcmp.lt.s32.totalorder %v49_v4, 8 }
  0xc2   :  { %459 = vrot.lane.b32.xlu0 %v422_v1, %s618_s30  ;;  %vm418_vm11 = vmand %vm1691_vm9, %vm413_vm7  ;;  %vm1433_vm7 = vcmp.eq.s32.totalorder %v52_v17, 1 }
  0xc3   :  { %v423_v39 = vsel %vm418_vm11, %v1245_v20, 0.0  ;;  %vm414_vm15 = vmxor %vm1692_vm1, %vm1681_vm6  ;;  %vm1416_vm6 = vcmp.eq.s32.totalorder %v60_v0, 1 }
  0xc4   :  { %461 = vrot.lane.b32.xlu1 %v423_v39, %s618_s30  ;;  %vm419_vm3 = vmand %vm1693_vm2, %vm414_vm15 }
  0xc5   :  { %v424_v18 = vsel %vm419_vm3, %v1271_v30, 0.0 }
  0xc6   :  { %463 = vrot.lane.b32.xlu0 %v424_v18, %s618_s30 }
 0x120   :  { %v477_v13 = vpop.permute.xlu1 %476 }
 0x121   :  { %v486_v55 = vrot.slane %v477_v13, 7 }
 0x127   :  { %v479_v51 = vpop.permute.xlu0 %478 }
 0x128   :  { %v487_v12 = vrot.slane %v479_v51, 7 }
 0x12a   :  { %v481_v56 = vpop.permute.xlu1 %480  ;;  %v494_v61 = vsel %vm470_vm4, %v486_v55, %v487_v12 }
 0x12b   :  { %v488_v63 = vrot.slane %v481_v56, 7  ;;  %v497_v22 = vsel %vm1416_vm6, %v494_v61, %v1340_v36 }
 0x12c   :  { %v483_v53 = vpop.permute.xlu0 %482 }
 0x12d   :  { %v489_v49 = vrot.slane %v483_v53, 7  ;;  %v493_v11 = vsel %vm470_vm4, %v487_v12, %v488_v63 }
 0x12e   :  { %v485_v62 = vpop.permute.xlu1 %484  ;;  %v498_v33 = vsel %vm1416_vm6, %v493_v11, %v1349_v59 }
 0x12f   :  { %v490_v48 = vrot.slane %v485_v62, 7 }
 0x130   :  { %v456_v35 = vpop.permute.xlu0 %455 }
 0x131   :  { %v495_v46 = vsel %vm470_vm4, %v490_v48, %v486_v55  ;;  %v501_v27 = vsel %vm1416_vm6, %v456_v35, %v405_v31  ;;  %v492_v31 = vsel %vm470_vm4, %v488_v63, %v489_v49  ;;  %v491_v45 = vsel %vm470_vm4, %v489_v49, %v490_v48 }
 0x132   :  { %v496_v16 = vsel %vm1416_vm6, %v495_v46, %v475_v10  ;;  %v458_v43 = vpop.permute.xlu1 %457  ;;  %v499_v60 = vsel %vm1416_vm6, %v492_v31, %v1363_v37  ;;  %vm1701_vm4 = vcmp.lt.s32.totalorder %v1634_v5, 36  ;;  %v500_v50 = vsel %vm1416_vm6, %v491_v45, %v1375_v26 }
 0x133   :  { %v506_v7 = vsel %vm55_vm8, %v496_v16, %v501_v27  ;;  %v502_v25 = vsel %vm1416_vm6, %v458_v43, %v406_v38  ;;  %vm72_vm9 = vmand %vm62_vm10, %vm1701_vm4 }
 0x134   :  { %v507_v21 = vsel %vm56_vm13, %v497_v22, %v502_v25  ;;  %v460_v52 = vpop.permute.xlu0 %459  ;;  %v511_v42 = vsel %vm62_vm10, %v506_v7, 0.0 }
 0x135   :  { %v512_v2 = vsel %vm62_vm10, %v507_v21, 0.0  ;;  %v503_v40 = vsel %vm1416_vm6, %v460_v52, %v407_v9  ;;  %516 = vst [vmem:[#allocation7] sm:$0xff] %v511_v42 }
 0x136   :  { %517 = vst [vmem:[#allocation7 + $0x8] sm:$0xff] %v512_v2  ;;  %v508_v41 = vsel %vm1433_vm7, %v498_v33, %v503_v40  ;;  %v462_v10 = vpop.permute.xlu1 %461 }
 0x137   :  { %v513_v38 = vsel %vm62_vm10, %v508_v41, 0.0  ;;  %v504_v44 = vsel %vm1416_vm6, %v462_v10, %v408_v8 }
 0x138   :  { %518 = vst [vmem:[#allocation7 + $0x10] sm:$0xff] %v513_v38  ;;  %v509_v6 = vsel %vm58_vm14, %v499_v60, %v504_v44  ;;  %v464_v36 = vpop.permute.xlu0 %463 }
 0x139   :  { %v514_v24 = vsel %vm62_vm10, %v509_v6, 0.0  ;;  %v505_v20 = vsel %vm1416_vm6, %v464_v36, %v409_v14 }
 0x13a   :  { %519 = vst [vmem:[#allocation7 + $0x18] sm:$0xff] %v514_v24  ;;  %v510_v59 = vsel %vm59_vm12, %v500_v50, %v505_v20 }
 0x13b   :  { %v515_v5 = vsel %vm72_vm9, %v510_v59, 0.0 }
 0x13c   :  { %520 = vst [vmem:[#allocation7 + $0x20] sm:$0xff] %v515_v5 }
 0x13d   :  { %597 = shalt.err (!%p594_p9)
}
 0x13e   :  { %532 = dma.vmem_to_hbm [thread:$0]  %s527_s4, 640, %s1491_s2, [#allocation4], %s614_s15, %s614_s15, %s615_s16  }
 0x13f   :  { %610 = dma.done.wait [#allocation4], 640  }
 0x140   :  { %611 = vsyncadd [#allocation4], 4294966656 }
 0x141   :  { %536 = vsyncpa [#allocation3], 1 }
 0x142   :  { %537 = vsyncpa [#allocation4], 1 }
 0x143   :  { %538 = vsyncpa [#allocation5], 1 }

</bundles_post_ra>
